<compile_context>
chip_gen: v7x
topology: tpu7x:2x2x1
jax: 0.10.0
libtpu: 0.0.40
codegen_flags: <defaults>
</compile_context>

<pallas_src>
import jax
import jax.numpy as jnp
from jax.experimental import pallas as pl
from jax.experimental.pallas import tpu as pltpu

# ------------------------------ configuration -------------------------------
BS            = 2                       # batch
N_VARS        = 4                       # channels / variables
D_MODEL       = 16
PATCH_NUM     = 16
NF            = D_MODEL * PATCH_NUM     # 256  (flattened feature dim, mult. of 128)
TARGET_WINDOW = 128                     # forecast horizon (mult. of 128 -> lane-dense)

_RESIDENT_VMEM_BUDGET = 8 * 1024 * 1024  # bytes; stay well under scoped VMEM on all chips


# --------------------------- Pallas kernel bodies ---------------------------
def _shared_head_kernel(x_ref, w_ref, b_ref, o_ref):
    """Shared head, everything resident: o = x @ W + b.
    x:[rows, nf] bf16, W:[nf, tw] bf16, b:[1, tw] f32 -> o:[rows, tw] f32."""
    o_ref[...] = (
        jnp.dot(x_ref[...], w_ref[...], preferred_element_type=jnp.float32)
        + b_ref[...]
    )


def _shared_head_tiled_kernel(x_ref, w_ref, b_ref, o_ref, acc_ref):
    """Tiled shared head: grid (rows/tm, tw/tn, nf/tk), f32 accumulator scratch."""
    k = pl.program_id(2)

    @pl.when(k == 0)
    def _():
        acc_ref[...] = jnp.zeros_like(acc_ref)

    acc_ref[...] += jnp.dot(x_ref[...], w_ref[...],
                            preferred_element_type=jnp.float32)

    @pl.when(k == pl.num_programs(2) - 1)
    def _():
        o_ref[...] = acc_ref[...] + b_ref[...]


def _individual_head_kernel(x_ref, w_ref, b_ref, o_ref):
    """Per-variable heads in ONE invocation (no grid).
    x:[bs, nv, nf] bf16, W:[nv, nf, tw] bf16, b:[nv, 1, tw] f32 -> o:[bs, nv, tw] f32.
    The n_vars loop is statically unrolled at trace time."""
    x = x_ref[...]                                   # one whole-tile load
    nv = w_ref.shape[0]
    for v in range(nv):                              # static unroll
        o_ref[:, v, :] = (
            jnp.dot(x[:, v, :], w_ref[v], preferred_element_type=jnp.float32)
            + b_ref[v]
        )


# ------------------------------- wrappers ------------------------------------
@jax.jit
def flatten_head_shared_tiled(x, w, b):
    """individual=False path, tiled for large nf / target_window / rows.
    x: [bs, n_vars, d_model, patch_num], w: [nf, tw] (pre-transposed), b: [tw]."""
    bs, nv, dm, pn = x.shape
    nf = dm * pn
    tw = w.shape[1]
    rows = bs * nv

    x2d = x.reshape(rows, nf).astype(jnp.bfloat16)   # Flatten + row merge: free layout
    wb = w.astype(jnp.bfloat16)
    b2d = b.reshape(1, tw).astype(jnp.float32)

    tm = rows if rows <= 128 else 128
    tn = tw if tw <= 128 else 128
    tk = nf if nf <= 256 else 256
    # TODO(synk): add ragged-edge masking for non-MXU-aligned nf / tw / rows.
    assert rows % tm == 0 and tw % tn == 0 and nf % tk == 0, \
        "tiled path requires tile-divisible dims"

    out = pl.pallas_call(
        _shared_head_tiled_kernel,
        out_shape=jax.ShapeDtypeStruct((rows, tw), jnp.float32),
        grid_spec=pltpu.PrefetchScalarGridSpec(
            num_scalar_prefetch=0,
            grid=(rows // tm, tw // tn, nf // tk),
            in_specs=[
                pl.BlockSpec((tm, tk), lambda i, j, k: (i, k)),
                pl.BlockSpec((tk, tn), lambda i, j, k: (k, j)),
                pl.BlockSpec((1, tn), lambda i, j, k: (0, j)),
            ],
            out_specs=pl.BlockSpec((tm, tn), lambda i, j, k: (i, j)),
            scratch_shapes=[pltpu.VMEM((tm, tn), jnp.float32)],
        ),
        compiler_params=pltpu.CompilerParams(
            dimension_semantics=("parallel", "parallel", "arbitrary"),
            vmem_limit_bytes=32 * 1024 * 1024,
        ),
        cost_estimate=pl.CostEstimate(
            flops=2 * rows * nf * tw,
            transcendentals=0,
            bytes_accessed=x2d.size * 2 + wb.size * 2 + rows * tw * 4 + tw * 4,
        ),
    )(x2d, wb, b2d)
    return out.reshape(bs, nv, tw)


@jax.jit
def flatten_head_shared(x, w, b):
    """individual=False path. Small heads: single VMEM-resident invocation;
    large heads auto-dispatch to the tiled path."""
    bs, nv, dm, pn = x.shape
    nf = dm * pn
    tw = w.shape[1]
    rows = bs * nv

    x2d = x.reshape(rows, nf).astype(jnp.bfloat16)
    wb = w.astype(jnp.bfloat16)
    b2d = b.reshape(1, tw).astype(jnp.float32)

    # double-buffered bf16 inputs + f32 bias/output
    footprint = 2 * (x2d.size * 2 + wb.size * 2) + rows * tw * 4 + tw * 4
    if footprint > _RESIDENT_VMEM_BUDGET:
        return flatten_head_shared_tiled(x, w, b)

    out = pl.pallas_call(
        _shared_head_kernel,
        out_shape=jax.ShapeDtypeStruct((rows, tw), jnp.float32),
        in_specs=[
            pl.BlockSpec(memory_space=pltpu.MemorySpace.VMEM),
            pl.BlockSpec(memory_space=pltpu.MemorySpace.VMEM),
            pl.BlockSpec(memory_space=pltpu.MemorySpace.VMEM),
        ],
        out_specs=pl.BlockSpec(memory_space=pltpu.MemorySpace.VMEM),
        cost_estimate=pl.CostEstimate(
            flops=2 * rows * nf * tw,
            transcendentals=0,
            bytes_accessed=x2d.size * 2 + wb.size * 2 + rows * tw * 4 + tw * 4,
        ),
    )(x2d, wb, b2d)
    return out.reshape(bs, nv, tw)


@jax.jit
def flatten_head_individual(x, w_stack, b_stack):
    """individual=True path, single invocation, no host-side transposes.
    x: [bs, n_vars, d_model, patch_num], w_stack: [n_vars, nf, tw], b_stack: [n_vars, tw]."""
    bs, nv, dm, pn = x.shape
    nf = dm * pn
    tw = w_stack.shape[2]

    x3d = x.reshape(bs, nv, nf).astype(jnp.bfloat16)       # free reshape only
    wb = w_stack.astype(jnp.bfloat16)
    b3d = b_stack.reshape(nv, 1, tw).astype(jnp.float32)

    # TODO(synk): add a tiled per-variable fallback for very large nf/tw/n_vars heads.
    return pl.pallas_call(
        _individual_head_kernel,
        out_shape=jax.ShapeDtypeStruct((bs, nv, tw), jnp.float32),
        in_specs=[
            pl.BlockSpec(memory_space=pltpu.MemorySpace.VMEM),
            pl.BlockSpec(memory_space=pltpu.MemorySpace.VMEM),
            pl.BlockSpec(memory_space=pltpu.MemorySpace.VMEM),
        ],
        out_specs=pl.BlockSpec(memory_space=pltpu.MemorySpace.VMEM),
        cost_estimate=pl.CostEstimate(
            flops=2 * bs * nv * nf * tw,
            transcendentals=0,
            bytes_accessed=x3d.size * 2 + wb.size * 2 + bs * nv * tw * 4 + nv * tw * 4,
        ),
    )(x3d, wb, b3d)


# --------------------------- pure-JAX references ------------------------------
_HI = jax.lax.Precision.HIGHEST


def _bf16(a):
    # Mirror the kernel's bf16 operand cast (f32 accumulation afterwards).
    return a.astype(jnp.bfloat16).astype(jnp.float32)


def ref_shared(x, w, b):
    bs, nv, dm, pn = x.shape
    z = _bf16(x).reshape(bs, nv, dm * pn)                  # Flatten(start_dim=-2)
    return jnp.einsum('bvn,nt->bvt', z, _bf16(w), precision=_HI) + b


def ref_individual(x, w_stack, b_stack):
    bs, nv, dm, pn = x.shape
    z = _bf16(x).reshape(bs, nv, dm * pn)
    y = jnp.einsum('bvn,vnt->bvt', z, _bf16(w_stack), precision=_HI)
    return y + b_stack[None, :, :]


# --------------------------------- main ---------------------------------------
if __name__ == "__main__":
    key = jax.random.PRNGKey(0)
    kx, kw, kb, kws, kbs, kx2, kw2, kb2 = jax.random.split(key, 8)

    # ---- shared head (individual = False), resident path ----
    x = jax.random.normal(kx, (BS, N_VARS, D_MODEL, PATCH_NUM), dtype=jnp.float32)
    w = ((NF ** -0.5) * jax.random.normal(kw, (NF, TARGET_WINDOW))).astype(jnp.float32)
    b = (0.02 * jax.random.normal(kb, (TARGET_WINDOW,))).astype(jnp.float32)

    y = jax.block_until_ready(flatten_head_shared(x, w, b))
    assert y.shape == (BS, N_VARS, TARGET_WINDOW), y.shape
    y_ref = ref_shared(x, w, b)
    assert bool(jnp.allclose(y, y_ref, atol=2e-3, rtol=2e-3)), \
        float(jnp.max(jnp.abs(y - y_ref)))

    # ---- individual head (individual = True), single invocation ----
    w_stack = ((NF ** -0.5)
               * jax.random.normal(kws, (N_VARS, NF, TARGET_WINDOW))).astype(jnp.float32)
    b_stack = (0.02 * jax.random.normal(kbs, (N_VARS, TARGET_WINDOW))).astype(jnp.float32)
    yi = jax.block_until_ready(flatten_head_individual(x, w_stack, b_stack))
    assert yi.shape == (BS, N_VARS, TARGET_WINDOW), yi.shape
    yi_ref = ref_individual(x, w_stack, b_stack)
    assert bool(jnp.allclose(yi, yi_ref, atol=2e-3, rtol=2e-3)), \
        float(jnp.max(jnp.abs(yi - yi_ref)))

    # ---- tiled shared-head path exercised at a (still small) multi-tile shape ----
    D2, P2, TW2 = 16, 32, 256            # nf = 512 -> 2 k-tiles; tw = 256 -> 2 n-tiles
    NF2 = D2 * P2
    x2 = jax.random.normal(kx2, (BS, N_VARS, D2, P2), dtype=jnp.float32)
    w2 = ((NF2 ** -0.5) * jax.random.normal(kw2, (NF2, TW2))).astype(jnp.float32)
    b2 = (0.02 * jax.random.normal(kb2, (TW2,))).astype(jnp.float32)
    y2 = jax.block_until_ready(flatten_head_shared_tiled(x2, w2, b2))
    assert y2.shape == (BS, N_VARS, TW2), y2.shape
    y2_ref = ref_shared(x2, w2, b2)
    assert bool(jnp.allclose(y2, y2_ref, atol=2e-3, rtol=2e-3)), \
        float(jnp.max(jnp.abs(y2 - y2_ref)))

    assert bool(jnp.all(jnp.isfinite(y))) and bool(jnp.all(jnp.isfinite(yi))) \
        and bool(jnp.all(jnp.isfinite(y2)))
    print("KERNEL_OK")
</pallas_src>

<mosaic_0001>
module attributes {stable_mosaic.version = 11 : i64} {
  func.func @_shared_head_kernel(%arg0: memref<8x256xbf16, #tpu.memory_space<vmem>>, %arg1: memref<256x128xbf16, #tpu.memory_space<vmem>>, %arg2: memref<1x128xf32, #tpu.memory_space<vmem>>, %arg3: memref<8x128xf32, #tpu.memory_space<vmem>>) attributes {dimension_semantics = [], scalar_prefetch = 0 : i64, scratch_operands = 0 : i64, tpu.core_type = #tpu.core_type<tc>} {
    %c0 = arith.constant 0 : index
    %c0_0 = arith.constant 0 : index
    %0 = vector.load %arg0[%c0, %c0_0] : memref<8x256xbf16, #tpu.memory_space<vmem>>, vector<8x256xbf16>
    %c0_1 = arith.constant 0 : index
    %c0_2 = arith.constant 0 : index
    %1 = vector.load %arg1[%c0_1, %c0_2] : memref<256x128xbf16, #tpu.memory_space<vmem>>, vector<256x128xbf16>
    %cst = arith.constant dense<0.000000e+00> : vector<8x128xf32>
    %2 = tpu.matmul %0, %1, %cst {dimension_numbers = #tpu.dot_dimension_numbers<[1], [0], [0], [1], [0, 0, 1, 1], [], []>} : vector<8x256xbf16>, vector<256x128xbf16>, vector<8x128xf32> -> vector<8x128xf32>
    %c0_3 = arith.constant 0 : index
    %c0_4 = arith.constant 0 : index
    %3 = vector.load %arg2[%c0_3, %c0_4] : memref<1x128xf32, #tpu.memory_space<vmem>>, vector<1x128xf32>
    %4 = vector.broadcast %3 : vector<1x128xf32> to vector<8x128xf32>
    %5 = arith.addf %2, %4 : vector<8x128xf32>
    %c0_5 = arith.constant 0 : index
    %c0_6 = arith.constant 0 : index
    %6 = vector.load %arg3[%c0_5, %c0_6] : memref<8x128xf32, #tpu.memory_space<vmem>>, vector<8x128xf32>
    tpu.vector_store %arg3[%c0_5, %c0_6], %5 {strides = array<i32>} : memref<8x128xf32, #tpu.memory_space<vmem>>, vector<8x128xf32>,
    return
  }
}

</mosaic_0001>

<bundles_post_ra>
// kernel: flatten_head_shared.1
= control target key start
LH: loop header
LB: loop body
LE: loop exit
PB: predicated region body
PF: predicated region fallthrough
CT: control target
= control target key end

     0   :  { %s385_s0 = inlined_call_operand.vmem [shape: bf16[8,256], index: 0, kind: input, shape index: {}]   ;;  %s386_s1 = inlined_call_operand.vmem [shape: bf16[256,128], index: 1, kind: input, shape index: {}]   ;;  %s387_s2 = inlined_call_operand.vmem [shape: f32[1,128], index: 2, kind: input, shape index: {}]   ;;  %s388_s3 = inlined_call_operand.hbm [shape: f32[8,128], index: 3, kind: output, shape index: {}]  }
   0x1   :  { %v256_v0 = vld [vmem:[%s386_s1 + $0x40] sm:$0xff]   ;;  %v258_v2 = vld [vmem:[%s386_s1 + $0x48] sm:$0xff]   ;;  %v260_v4 = vld [vmem:[%s386_s1 + $0x50] sm:$0xff]  }
   0x2   :  { %v257_v1 = vld [vmem:[%s386_s1] sm:$0xff]   ;;  %233 = vmatprep.subr.bf16.mxu0 %v256_v0  ;;  %v259_v3 = vld [vmem:[%s386_s1 + $0x8] sm:$0xff]   ;;  %v261_v5 = vld [vmem:[%s386_s1 + $0x10] sm:$0xff]  }
   0x3   :  { %234 = vmatpush3.bf16.msra.mxu0 %v257_v1  ;;  %v262_v6 = vld [vmem:[%s386_s1 + $0x58] sm:$0xff]   ;;  %v264_v8 = vld [vmem:[%s386_s1 + $0x60] sm:$0xff]   ;;  %v266_v10 = vld [vmem:[%s386_s1 + $0x68] sm:$0xff]  }
   0x4   :  { %235 = vmatprep.subr.bf16.mxu0 %v258_v2  ;;  %v263_v7 = vld [vmem:[%s386_s1 + $0x18] sm:$0xff]   ;;  %v265_v9 = vld [vmem:[%s386_s1 + $0x20] sm:$0xff]  }
   0x5   :  { %v16_v11 = vld [vmem:[%s385_s0] sm:$0xff] }
   0x7   :  { %236 = vmatpush3.bf16.msra.mxu0 %v259_v3 }
   0x8   :  { %237 = vmatprep.subr.bf16.mxu0 %v260_v4 }
   0xb   :  { %238 = vmatpush3.bf16.msra.mxu0 %v261_v5 }
   0xc   :  { %239 = vmatprep.subr.bf16.mxu0 %v262_v6 }
   0xf   :  { %240 = vmatpush3.bf16.msra.mxu0 %v263_v7 }
  0x10   :  { %241 = vmatprep.subr.bf16.mxu0 %v264_v8 }
  0x11   :  { %8 = vsyncpa [#allocation3], 0  ;;  %v216_v12 = vcombine.high %v16_v11, %v16_v11  ;;  %v267_v13 = vld [vmem:[%s386_s1 + $0x28] sm:$0xff]   ;;  %v268_v14 = vld [vmem:[%s386_s1 + $0x70] sm:$0xff]   ;;  %v215_v18 = vcombine.low %v16_v11, %v16_v11  ;;  %s298_s20 = smov [#allocation2]  }
  0x12   :  { %v269_v15 = vld [vmem:[%s386_s1 + $0x30] sm:$0xff]   ;;  %v270_v16 = vld [vmem:[%s386_s1 + $0x78] sm:$0xff]   ;;  %v214_v21 = vld [vmem:[%s387_s2] ss:$0 sm:$0xff]  ;;  %s206_s21 = sshll.u32 %s298_s20, 4  ;;  %s207_s21 = int_to_ptr.vmem [resolvable:$true] %s206_s21 }
  0x13   :  { %242 = vmatpush3.bf16.msra.mxu0 %v265_v9  ;;  %191 = vmatprep.mubr.bf16.mxu0 %v216_v12  ;;  %v271_v17 = vld [vmem:[%s386_s1 + $0x38] sm:$0xff]   ;;  %s274_s22 = scalar_lea.vmem %s207_s21, 128  ;;  %p279_p1 = scmp.lt.s32.totalorder %s207_s21, %s207_s21 }
  0x14   :  { %243 = vmatprep.subr.bf16.mxu0 %v266_v10  ;;  %p275_p0 = scmp.ne.s32.totalorder %s207_s21, %s274_s22  ;;  %p280_p2 = scmp.lt.s32.totalorder %s274_s22, %s274_s22 }
  0x16   :  { %p281_p3 = por %p280_p2, %p279_p1 }
  0x17   :  { %244 = vmatpush3.bf16.msra.mxu0 %v267_v13 }
  0x18   :  { %245 = vmatprep.subr.bf16.mxu0 %v268_v14  ;;  %p282_p4 = pnand %p281_p3, %p275_p0 }
  0x1b   :  { %246 = vmatpush3.bf16.msra.mxu0 %v269_v15 }
  0x1c   :  { %247 = vmatprep.subr.bf16.mxu0 %v270_v16 }
  0x1f   :  { %248 = vmatpush3.bf16.msra.mxu0 %v271_v17 }
  0x22   :  { %192 = vmatmul.mubr.bf16.vlgmr.msra.gmra.mrb[0].mxu0 %v215_v18 }
  0xf5   :  { %v249_v19 = vpop.f32.mrb[0].mxu0 }
  0xf6   :  { %v250_v20 = vpop.f32.mrb[1].mxu0 }
  0xf7   :  { %v251_v22 = vadd.f32 %v250_v20, %v249_v19  ;;  %v252_v23 = vpop.f32.mrb[2].mxu0 }
  0xf8   :  { %v253_v24 = vpop.f32.mrb[3].mxu0 }
  0xf9   :  { %v194_v25 = vadd.f32 %v251_v22, %v214_v21 }
  0xfb   :  { %199 = vst [vmem:[#allocation2] sm:$0xff] %v194_v25 }
  0xfc   :  { %285 = shalt.err (!%p282_p4)
}
  0xfd   :  { %s286_s24 = scalar_lea.hbm %s388_s3, 128 }
  0xfe   :  { %p287_p5 = scmp.ne.s32.totalorder %s388_s3, %s286_s24  ;;  %p290_p6 = scmp.lt.u32.totalorder %s286_s24, %s388_s3 }
 0x100   :  { %p292_p7 = pnand %p290_p6, %p287_p5 }
 0x102   :  { %295 = shalt.err (!%p292_p7)
}
 0x103   :  { %209 = dma.vmem_to_hbm [thread:$0]  %s207_s21, 128, %s388_s3, [#allocation3]  }
 0x104   :  { %296 = dma.done.wait [#allocation3], 128  }
 0x105   :  { %297 = vsyncadd [#allocation3], 4294967168 }
 0x106   :  { %213 = vsyncpa [#allocation3], 1 }

</bundles_post_ra>
